<compile_context>
chip_gen: v7x
topology: tpu7x:2x2x1
jax: 0.10.0
libtpu: 0.0.40
codegen_flags: <defaults>
</compile_context>

<pallas_src>
import functools

import jax
import jax.numpy as jnp
from jax.experimental import pallas as pl
from jax.experimental.pallas import tpu as pltpu

_FUSE_THRESHOLD_BYTES = 2 << 20   # fuse the two stages if the activation fits easily in VMEM


# --------------------------- Stage 1: mean pool -----------------------------

def _mean_pool_kernel(x_ref, o_ref, acc_ref, *, inv_t, true_t, tile_t, needs_mask):
    # grid = (B_tiles, T_tiles); T (reduction) axis is last and "arbitrary".
    j = pl.program_id(1)
    last = pl.num_programs(1) - 1

    @pl.when(j == 0)
    def _():
        acc_ref[...] = jnp.zeros_like(acc_ref)

    def accumulate(x):
        tb, tt, h = x.shape
        if tt % 8 == 0:
            # vreg-wise: add 8-sublane slabs (pure VALU); sublane collapse deferred to the end.
            acc_ref[...] += jnp.sum(x.reshape(tb, tt // 8, 8, h), axis=1)
        else:
            # whole-T-in-one-tile fallback (single XLU reduce, runs once).
            acc_ref[:, 0:1, :] += jnp.sum(x, axis=1, keepdims=True)

    x = x_ref[...].astype(jnp.float32)

    if needs_mask:
        # Ragged token tail: only the last T tile needs masking (no HBM pad copy of x).
        @pl.when(j == last)
        def _():
            tok = j * tile_t + jax.lax.broadcasted_iota(jnp.int32, x.shape, 1)
            accumulate(jnp.where(tok < true_t, x, 0.0))

        @pl.when(j != last)
        def _():
            accumulate(x)
    else:
        accumulate(x)

    @pl.when(j == last)
    def _():
        # Single sublane collapse + scale, written straight to the resident output block.
        o_ref[...] = (jnp.sum(acc_ref[...], axis=1) * inv_t).astype(o_ref.dtype)


def _choose_pool_tiles(B, T, H, itemsize, budget_bytes):
    # >= 2 parallel batch steps when B >= 2 so v7x can shard the pool across both TCs.
    # TODO(synk): for B == 1, add a parallel T-halves split (two partial sums) to engage
    # both v7x TensorCores; single-TC chips are unaffected.
    tile_b = 1 if B < 2 else min(8, pl.cdiv(B, 2))
    max_t = max(8, budget_bytes // max(1, tile_b * H * itemsize))
    tile_t = T if T <= max_t else (max_t // 8) * 8
    return tile_b, tile_t


def mean_pool(x, *, tile_b=None, tile_t=None, budget_bytes=12 << 20):
    """[B, T, H] -> [B, H] (f32), mean over the token axis. No HBM pad copy of x."""
    B, T, H = x.shape
    auto_b, auto_t = _choose_pool_tiles(B, T, H, x.dtype.itemsize, budget_bytes)
    tile_b = auto_b if tile_b is None else min(int(tile_b), B)
    tile_t = auto_t if tile_t is None else min(int(tile_t), T)
    if tile_t < T:
        assert tile_t % 8 == 0, "tile_t must be a multiple of 8 when it tiles T"

    grid = (pl.cdiv(B, tile_b), pl.cdiv(T, tile_t))
    needs_mask = (T % tile_t) != 0

    tile_bytes = tile_b * tile_t * H * x.dtype.itemsize
    vmem_limit = int(2 * tile_bytes + tile_b * 9 * H * 4 + (4 << 20))

    cost = pl.CostEstimate(
        flops=B * T * H,
        bytes_accessed=B * T * H * x.dtype.itemsize + B * H * 4,
        transcendentals=0,
    )
    return pl.pallas_call(
        functools.partial(_mean_pool_kernel, inv_t=1.0 / T, true_t=T,
                          tile_t=tile_t, needs_mask=needs_mask),
        out_shape=jax.ShapeDtypeStruct((B, H), jnp.float32),
        grid_spec=pltpu.PrefetchScalarGridSpec(
            num_scalar_prefetch=0,
            grid=grid,
            in_specs=[pl.BlockSpec((tile_b, tile_t, H), lambda i, j: (i, j, 0))],
            out_specs=pl.BlockSpec((tile_b, H), lambda i, j: (i, 0)),
            scratch_shapes=[pltpu.VMEM((tile_b, 8, H), jnp.float32)],
        ),
        compiler_params=pltpu.CompilerParams(
            dimension_semantics=("parallel", "arbitrary"),
            vmem_limit_bytes=vmem_limit),
        cost_estimate=cost,
    )(x)


# ------------------------- Stage 2: linear classifier -----------------------

def _classifier_kernel(p_ref, w_ref, b_ref, o_ref):
    # p_ref: (B, H) pooled (resident across N tiles), w_ref: (H, tile_n),
    # b_ref: (1, tile_n), o_ref: (B, tile_n).  Operands keep native dtype
    # (bf16 stays bf16 for the MXU); accumulate / bias add in f32.
    logits = jnp.dot(p_ref[...], w_ref[...], preferred_element_type=jnp.float32)
    o_ref[...] = (logits + b_ref[...].astype(jnp.float32)).astype(o_ref.dtype)


def prepare_classifier_params(weight, bias, *, weight_dtype=None, tile_n=None,
                              vmem_budget_bytes=8 << 20):
    """One-time parameter prep (call OUTSIDE the jit'd forward).

    Transposes weight [N, H] -> [H, N], optionally casts it (e.g. bf16 to halve head
    weight streaming; bias and accumulation stay f32), and pads N so the lane-aligned
    tile_n yields an EVEN number (>= 2) of column tiles -> the "parallel" N grid can
    shard across v7x's two TensorCores while a VMEM budget clamps the tile for large H.
    """
    N, H = weight.shape
    w = jnp.asarray(weight)
    if weight_dtype is not None:
        w = w.astype(weight_dtype)
    itemsize = jnp.dtype(w.dtype).itemsize
    if tile_n is None:
        budget_tile = max(128, (vmem_budget_bytes // max(1, H * itemsize)) // 128 * 128)
        half_tile = pl.cdiv(pl.cdiv(N, 2), 128) * 128     # ensures >= 2 grid steps
        tile_n = int(min(budget_tile, half_tile))
    n_tiles = max(2, pl.cdiv(N, tile_n))
    if n_tiles % 2:
        n_tiles += 1                                      # even -> balanced 2-way core split
    Np = n_tiles * tile_n

    w_t = w.T                                             # (H, N)
    b = jnp.asarray(bias).astype(jnp.float32)
    if Np != N:
        w_t = jnp.pad(w_t, ((0, 0), (0, Np - N)))
        b = jnp.pad(b, (0, Np - N))
    return w_t, b.reshape(1, -1), int(N), int(tile_n)


def _classifier_forward(pooled, w_t, bias_p, *, num_classes, tile_n):
    B, H = pooled.shape
    Np = w_t.shape[1]
    n_tiles = Np // tile_n
    # NOTE: when w_t is bf16, pooled is downcast f32->bf16 for the MXU (f32 accumulation).
    pooled_mm = pooled if pooled.dtype == w_t.dtype else pooled.astype(w_t.dtype)

    wtile_bytes = H * tile_n * w_t.dtype.itemsize
    vmem_limit = int(2 * (wtile_bytes + (B + 1) * tile_n * 4)
                     + B * H * (pooled_mm.dtype.itemsize + 4) + (2 << 20))
    cost = pl.CostEstimate(
        flops=2 * B * H * Np,
        bytes_accessed=(Np * H * w_t.dtype.itemsize
                        + B * H * pooled_mm.dtype.itemsize + B * Np * 4 + Np * 4),
        transcendentals=0,
    )
    out = pl.pallas_call(
        _classifier_kernel,
        out_shape=jax.ShapeDtypeStruct((B, Np), jnp.float32),
        grid_spec=pltpu.PrefetchScalarGridSpec(
            num_scalar_prefetch=0,
            grid=(n_tiles,),                              # always >= 2 steps (even)
            in_specs=[
                pl.BlockSpec((B, H), lambda j: (0, 0)),        # pooled, resident
                pl.BlockSpec((H, tile_n), lambda j: (0, j)),   # weight column tile
                pl.BlockSpec((1, tile_n), lambda j: (0, j)),   # bias tile
            ],
            out_specs=pl.BlockSpec((B, tile_n), lambda j: (0, j)),
        ),
        compiler_params=pltpu.CompilerParams(
            dimension_semantics=("parallel",),            # N tiles shard across v7x TCs
            vmem_limit_bytes=vmem_limit),
        cost_estimate=cost,
    )(pooled_mm, w_t, bias_p)
    return out[:, :num_classes]


# -------------------- Fused pool + classifier (small x) ---------------------

def _fused_kernel(x_ref, w_ref, b_ref, o_ref, pooled_ref, *, inv_t):
    # grid = (2, n_half): outer "parallel" axis splits the weight tiles across v7x's two
    # TensorCores; inner "arbitrary" axis walks this core's tiles.  x is resident
    # (constant index_map); pooled is computed once per core at j == 0.
    j = pl.program_id(1)

    @pl.when(j == 0)
    def _():
        x = x_ref[...].astype(jnp.float32)                                # (B, T, H)
        pooled_ref[...] = (jnp.sum(x, axis=1) * inv_t).astype(pooled_ref.dtype)

    logits = jnp.dot(pooled_ref[...], w_ref[...], preferred_element_type=jnp.float32)
    o_ref[...] = (logits + b_ref[...].astype(jnp.float32)).astype(o_ref.dtype)


def _fused_forward(x, w_t, bias_p, *, num_classes, tile_n):
    B, T, H = x.shape
    Np = w_t.shape[1]
    n_tiles = Np // tile_n
    n_half = n_tiles // 2
    mm_dtype = w_t.dtype

    x_bytes = B * T * H * x.dtype.itemsize
    wtile_bytes = H * tile_n * w_t.dtype.itemsize
    vmem_limit = int(x_bytes + 2 * (wtile_bytes + (B + 1) * tile_n * 4)
                     + B * H * 8 + (2 << 20))
    cost = pl.CostEstimate(
        flops=2 * B * H * Np + B * T * H,
        bytes_accessed=(x_bytes + Np * H * w_t.dtype.itemsize + Np * 4 + B * Np * 4),
        transcendentals=0,
    )
    out = pl.pallas_call(
        functools.partial(_fused_kernel, inv_t=1.0 / T),
        out_shape=jax.ShapeDtypeStruct((B, Np), jnp.float32),
        grid_spec=pltpu.PrefetchScalarGridSpec(
            num_scalar_prefetch=0,
            grid=(2, n_half),
            in_specs=[
                pl.BlockSpec((B, T, H), lambda i, j: (0, 0, 0)),              # resident x
                pl.BlockSpec((H, tile_n), lambda i, j: (0, i * n_half + j)),  # weight tile
                pl.BlockSpec((1, tile_n), lambda i, j: (0, i * n_half + j)),  # bias tile
            ],
            out_specs=pl.BlockSpec((B, tile_n), lambda i, j: (0, i * n_half + j)),
            scratch_shapes=[pltpu.VMEM((B, H), mm_dtype)],
        ),
        compiler_params=pltpu.CompilerParams(
            dimension_semantics=("parallel", "arbitrary"),
            vmem_limit_bytes=vmem_limit),
        cost_estimate=cost,
    )(x, w_t, bias_p)
    return out[:, :num_classes]


# --------------------------------- Forward ----------------------------------

@functools.partial(jax.jit,
                   static_argnames=("num_classes", "tile_n", "force_two_stage"))
def vision_classifier_forward(image_embeds, w_t, bias_p, *, num_classes, tile_n,
                              force_two_stage=False):
    """image_embeds: [B,T,H] or [T,H]; w_t: [H,Np] (pre-transposed/padded); bias_p: [1,Np]."""
    if image_embeds.ndim == 2:
        image_embeds = image_embeds[None, ...]            # unsqueeze(0)
    B, T, H = image_embeds.shape
    Np = w_t.shape[1]
    n_tiles = Np // tile_n

    x_bytes = B * T * H * image_embeds.dtype.itemsize
    use_fused = (not force_two_stage
                 and x_bytes <= _FUSE_THRESHOLD_BYTES
                 and n_tiles % 2 == 0)
    if use_fused:
        return _fused_forward(image_embeds, w_t, bias_p,
                              num_classes=num_classes, tile_n=tile_n)

    pooled = mean_pool(image_embeds)                      # (B, H) f32, never padded in HBM
    return _classifier_forward(pooled, w_t, bias_p,
                               num_classes=num_classes, tile_n=tile_n)


def init_params(key, hidden_size, num_classes):
    """Deterministic init mimicking nn.Linear default (uniform +/- 1/sqrt(fan_in))."""
    kw, kb = jax.random.split(key)
    bound = 1.0 / (hidden_size ** 0.5)
    weight = jax.random.uniform(kw, (num_classes, hidden_size),
                                minval=-bound, maxval=bound, dtype=jnp.float32)
    bias = jax.random.uniform(kb, (num_classes,),
                              minval=-bound, maxval=bound, dtype=jnp.float32)
    return weight, bias


# TODO(synk): resize_classifier is host-side parameter management (re-init + copy); it has
# no kernel equivalent and is handled by re-running prepare_classifier_params.

if __name__ == "__main__":
    key = jax.random.PRNGKey(0)
    k_x, k_p, k_x2, k_p2 = jax.random.split(key, 4)

    # --- A: fused path (module-default head, small embeds) ------------------
    B, T, H = 2, 8, 32
    NUM_CLASSES = 3250
    x = jax.random.normal(k_x, (B, T, H), dtype=jnp.float32)
    weight, bias = init_params(k_p, H, NUM_CLASSES)
    w_t, bias_p, n_cls, tile_n = prepare_classifier_params(weight, bias)
    logits = jax.block_until_ready(
        vision_classifier_forward(x, w_t, bias_p, num_classes=n_cls, tile_n=tile_n))
    ref = jnp.matmul(jnp.mean(x, axis=1), weight.T, precision="highest") + bias
    assert logits.shape == (B, NUM_CLASSES), logits.shape
    assert jnp.allclose(logits, ref, atol=1e-4, rtol=1e-4)

    # --- B: two-stage path (pool kernel + classifier kernel) ----------------
    B2, T2, H2 = 3, 200, 256
    x2 = jax.random.normal(k_x2, (B2, T2, H2), dtype=jnp.float32)
    weight2, bias2 = init_params(k_p2, H2, NUM_CLASSES)
    w_t2, bias_p2, n_cls2, tile_n2 = prepare_classifier_params(weight2, bias2)
    logits2 = jax.block_until_ready(
        vision_classifier_forward(x2, w_t2, bias_p2, num_classes=n_cls2,
                                  tile_n=tile_n2, force_two_stage=True))
    ref2 = jnp.matmul(jnp.mean(x2, axis=1), weight2.T, precision="highest") + bias2
    assert logits2.shape == (B2, NUM_CLASSES), logits2.shape
    assert jnp.allclose(logits2, ref2, atol=1e-3, rtol=1e-3)

    # --- C: pool kernel with ragged token tail (in-kernel mask) + ragged B --
    pooled_c = jax.block_until_ready(mean_pool(x2, tile_b=2, tile_t=64))
    assert jnp.allclose(pooled_c, jnp.mean(x2, axis=1), atol=1e-5, rtol=1e-5)

    # --- D: bf16 weight streaming for the head (f32 accumulation) -----------
    w_t_bf, bias_p_bf, n_cls_bf, tile_n_bf = prepare_classifier_params(
        weight, bias, weight_dtype=jnp.bfloat16)
    logits_bf = jax.block_until_ready(
        vision_classifier_forward(x, w_t_bf, bias_p_bf,
                                  num_classes=n_cls_bf, tile_n=tile_n_bf))
    pooled_bf = jnp.mean(x, axis=1).astype(jnp.bfloat16).astype(jnp.float32)
    w_bf = weight.astype(jnp.bfloat16).astype(jnp.float32)
    ref_bf = jnp.matmul(pooled_bf, w_bf.T, precision="highest") + bias
    assert jnp.allclose(logits_bf, ref_bf, atol=2e-2, rtol=2e-2)

    print("KERNEL_OK")
</pallas_src>

<mosaic_0001>
module attributes {stable_mosaic.version = 11 : i64} {
  func.func @_fused_kernel(%arg0: i32, %arg1: i32, %arg2: memref<2x8x32xf32, #tpu.memory_space<vmem>>, %arg3: memref<32x1664xf32, #tpu.memory_space<vmem>>, %arg4: memref<1x1664xf32, #tpu.memory_space<vmem>>, %arg5: memref<2x1664xf32, #tpu.memory_space<vmem>>, %arg6: memref<2x32xf32, #tpu.memory_space<vmem>>) attributes {dimension_semantics = [#tpu.dimension_semantics<parallel>, #tpu.dimension_semantics<arbitrary>], iteration_bounds = array<i64: 2, 1>, scalar_prefetch = 0 : i64, scratch_operands = 1 : i64, tpu.core_type = #tpu.core_type<tc>, window_params = [{pipeline_mode = #tpu.pipeline_mode<synchronous>, transform_indices = @transform_0, window_bounds = array<i64: 2, 8, 32>}, {transform_indices = @transform_1, window_bounds = array<i64: 32, 1664>}, {transform_indices = @transform_2, window_bounds = array<i64: 1, 1664>}, {transform_indices = @transform_3, window_bounds = array<i64: 2, 1664>}]} {
    %c0_i32 = arith.constant 0 : i32
    %0 = arith.cmpi eq, %arg1, %c0_i32 : i32
    %1 = arith.extui %0 : i1 to i32
    %c0_i32_0 = arith.constant 0 : i32
    %2 = arith.cmpi ne, %1, %c0_i32_0 : i32
    scf.if %2 {
      %c0_8 = arith.constant 0 : index
      %c0_9 = arith.constant 0 : index
      %c0_10 = arith.constant 0 : index
      %10 = vector.load %arg2[%c0_8, %c0_9, %c0_10] : memref<2x8x32xf32, #tpu.memory_space<vmem>>, vector<2x8x32xf32>
      %cst_11 = arith.constant dense<0.000000e+00> : vector<2x32xf32>
      %11 = vector.multi_reduction <add>, %10, %cst_11 [1] : vector<2x8x32xf32> to vector<2x32xf32>
      %cst_12 = arith.constant 1.250000e-01 : f32
      %12 = vector.broadcast %cst_12 : f32 to vector<2x32xf32>
      %13 = arith.mulf %11, %12 : vector<2x32xf32>
      %c0_13 = arith.constant 0 : index
      %c0_14 = arith.constant 0 : index
      %14 = vector.load %arg6[%c0_13, %c0_14] : memref<2x32xf32, #tpu.memory_space<vmem>>, vector<2x32xf32>
      tpu.vector_store %arg6[%c0_13, %c0_14], %13 {strides = array<i32>} : memref<2x32xf32, #tpu.memory_space<vmem>>, vector<2x32xf32>,
    } else {
    }
    %c0 = arith.constant 0 : index
    %c0_1 = arith.constant 0 : index
    %3 = vector.load %arg6[%c0, %c0_1] : memref<2x32xf32, #tpu.memory_space<vmem>>, vector<2x32xf32>
    %c0_2 = arith.constant 0 : index
    %c0_3 = arith.constant 0 : index
    %4 = vector.load %arg3[%c0_2, %c0_3] : memref<32x1664xf32, #tpu.memory_space<vmem>>, vector<32x1664xf32>
    %cst = arith.constant dense<0.000000e+00> : vector<2x1664xf32>
    %5 = tpu.matmul %3, %4, %cst {dimension_numbers = #tpu.dot_dimension_numbers<[1], [0], [0], [1], [0, 0, 1, 1], [], []>} : vector<2x32xf32>, vector<32x1664xf32>, vector<2x1664xf32> -> vector<2x1664xf32>
    %c0_4 = arith.constant 0 : index
    %c0_5 = arith.constant 0 : index
    %6 = vector.load %arg4[%c0_4, %c0_5] : memref<1x1664xf32, #tpu.memory_space<vmem>>, vector<1x1664xf32>
    %7 = vector.broadcast %6 : vector<1x1664xf32> to vector<2x1664xf32>
    %8 = arith.addf %5, %7 : vector<2x1664xf32>
    %c0_6 = arith.constant 0 : index
    %c0_7 = arith.constant 0 : index
    %9 = vector.load %arg5[%c0_6, %c0_7] : memref<2x1664xf32, #tpu.memory_space<vmem>>, vector<2x1664xf32>
    tpu.vector_store %arg5[%c0_6, %c0_7], %8 {strides = array<i32>} : memref<2x1664xf32, #tpu.memory_space<vmem>>, vector<2x1664xf32>,
    return
  }
  func.func @transform_0(%arg0: i32, %arg1: i32) -> (i32, i32, i32) {
    %c0_i32 = arith.constant 0 : i32
    %c0_i32_0 = arith.constant 0 : i32
    %c0_i32_1 = arith.constant 0 : i32
    %c0_i32_2 = arith.constant 0 : i32
    return %c0_i32, %c0_i32_0, %c0_i32_1 : i32, i32, i32
  }
  func.func @transform_1(%arg0: i32, %arg1: i32) -> (i32, i32) {
    %c1_i32 = arith.constant 1 : i32
    %0 = arith.muli %arg0, %c1_i32 : i32
    %1 = arith.addi %0, %arg1 : i32
    %c0_i32 = arith.constant 0 : i32
    %c0_i32_0 = arith.constant 0 : i32
    return %c0_i32, %1 : i32, i32
  }
  func.func @transform_2(%arg0: i32, %arg1: i32) -> (i32, i32) {
    %c1_i32 = arith.constant 1 : i32
    %0 = arith.muli %arg0, %c1_i32 : i32
    %1 = arith.addi %0, %arg1 : i32
    %c0_i32 = arith.constant 0 : i32
    %c0_i32_0 = arith.constant 0 : i32
    return %c0_i32, %1 : i32, i32
  }
  func.func @transform_3(%arg0: i32, %arg1: i32) -> (i32, i32) {
    %c1_i32 = arith.constant 1 : i32
    %0 = arith.muli %arg0, %c1_i32 : i32
    %1 = arith.addi %0, %arg1 : i32
    %c0_i32 = arith.constant 0 : i32
    %c0_i32_0 = arith.constant 0 : i32
    return %c0_i32, %1 : i32, i32
  }
}

</mosaic_0001>

<bundles_post_ra>
// kernel: vision_classifier_forward.1
= control target key start
LH: loop header
LB: loop body
LE: loop exit
PB: predicated region body
PF: predicated region fallthrough
CT: control target
= control target key end

     0   :  { %s1868_s0 = inlined_call_operand.hbm [shape: f32[2,8,32], index: 0, kind: input, shape index: {}]   ;;  %s1869_s1 = inlined_call_operand.hbm [shape: f32[32,3328], index: 1, kind: input, shape index: {}]   ;;  %s1870_s2 = inlined_call_operand.hbm [shape: f32[1,3328], index: 2, kind: input, shape index: {}]   ;;  %s1871_s3 = inlined_call_operand.hbm [shape: f32[2,3328], index: 3, kind: output, shape index: {}]  }
   0x1   :  { %1880 = sst [smem:[#allocation14_spill]] %s1869_s1 }
   0x2   :  { %8 = vsyncpa [#allocation4], 0 }
   0x3   :  { %9 = vsyncpa [#allocation7], 0 }
   0x4   :  { %11 = vsyncpa [#allocation7 + $0x1], 0 }
   0x5   :  { %12 = vsyncpa [#allocation5], 0 }
   0x6   :  { %14 = vsyncpa [#allocation5 + $0x1], 0  ;;  %s1519_s12 = smov 0   ;;  %s1521_s13 = smov 0  }
   0x7   :  { %s1523_s14 = smov 0   ;;  %s1525_s15 = smov 0  }
   0x8   :  { %s1527_s16 = smov 0   ;;  %s1529_s17 = smov 0  }
   0x9 LB: > { %s32_s18 = sadd.s32 1, %s1480_s16  ;;  %s62_s19 = sadd.s32 1, %s1472_s14  ;;  %s1484_s17 = sphi %s1529_s17, %s20_s17   ;;  %s1480_s16 = sphi %s1527_s16, %s1904_s16   ;;  %s1476_s15 = sphi %s1525_s15, %s1903_s15   ;;  %s1472_s14 = sphi %s1523_s14, %s1902_s14   ;;  %s1468_s13 = sphi %s1521_s13, %s1901_s13   ;;  %s1464_s12 = sphi %s1519_s12, %s1900_s12  }
   0xa   : > { %p34_p0 = scmp.ge.s32.totalorder %s32_s18, 2  ;;  %p69_p1 = scmp.ne.s32.totalorder %s1472_s14, %s1468_s13 }
   0xb   : > { %p70_p2 = scmp.eq.s32.totalorder %s1484_s17, 0  ;;  %p1249_p5 = scmp.lt.s32.totalorder %s1484_s17, 2 }
   0xc   : > { %s1906_s18 = smov (%p34_p0, %s32_s18), 0  ;;  %s168_s21 = sand.u32 1, %s1484_s17  }
   0xd   : > { %1881 = sst [smem:[#allocation13_spill]] %s1906_s18  ;;  %p71_p4 = por %p70_p2, %p69_p1 }
   0xe   : > { %s59_s20 = ssub.s32 %s1480_s16, %s1906_s18  ;;  %s170_s22 = sand.u32 1, %s1472_s14  }
   0xf   : > { %p60_p6 = scmp.eq.s32.totalorder %s59_s20, 0  ;;  %s1145_s23 = smul.u32 1664, %s1480_s16 }
  0x10   : > { %s1218_s25 = smul.u32 416, %s170_s22  ;;  %s1882_s1 = sld [smem:[#allocation14_spill]] }
  0x11   : > { %s1567_s24 = scalar_select %p60_p6, %s1472_s14, %s62_s19  }
  0x12   : > { %p1576_p7 = pnand %p1249_p5, %p71_p4  ;;  %s172_s30 = scalar_lea.vmem [#allocation6], %s1218_s25 }
  0x13   : > { %s180_s4 = sshll.u32 %s172_s30, 4  ;;  %s1582_s5 = scalar_lea.sflag [#allocation7], %s168_s21  ;;  %s1580_s4 = int_to_ptr.vmem [resolvable:$true] %s180_s4 }
  0x14   : > { %s1883_s29 = scalar_select %p1576_p7, 1, 0 }
  0x15   : > { %p1874_p9 = pneg %p1576_p7 }
  0x16   : > { %s1574_s28 = scalar_lea.hbm %s1882_s1, %s1145_s23  ;;  %s1315_s9 = scalar_lea.hbm %s1882_s1, 13312 }
  0x17   : > { %s1310_s6 = scalar_lea.hbm %s1574_s28, 6656  ;;  %p1316_p12 = scmp.lt.u32.totalorder %s1574_s28, %s1882_s1 }
  0x18   : > { %p1311_p8 = scmp.ne.s32.totalorder %s1574_s28, %s1310_s6  ;;  %p1317_p13 = scmp.lt.u32.totalorder %s1315_s9, %s1310_s6 }
  0x19   : > { %p1319_p2 = scmp.lt.u32.totalorder %s1310_s6, %s1574_s28 }
  0x1a   : > { %p1313_p10 = pnand %p1874_p9, %p1311_p8  ;;  %p1318_p0 = por %p1317_p13, %p1316_p12 }
  0x1c   : > { %p1314_p11 = pneg %p1313_p10  ;;  %p1320_p4 = por %p1319_p2, %p1318_p0 }
  0x1e   : > { %p1321_p5 = pnand %p1320_p4, %p1314_p11 }
  0x20   : > { %1324 = shalt.err (!%p1321_p5)
}
  0x21   : > { %s1325_s19 = scalar_lea.vmem %s1580_s4, 6656  ;;  %s1486_s20 = smov [#allocation6]  }
  0x22   : > { %p1326_p6 = scmp.ne.s32.totalorder %s1580_s4, %s1325_s19  ;;  %s1330_s21 = sshll.u32 %s1486_s20, 4  ;;  %s1331_s21 = int_to_ptr.vmem [resolvable:$false] %s1330_s21 }
  0x23   : > { %s1332_s23 = scalar_lea.vmem %s1331_s21, 13312  ;;  %p1333_p3 = scmp.lt.s32.totalorder %s1580_s4, %s1331_s21 }
  0x24   : > { %p1328_p8 = pnand %p1326_p6, %p1874_p9  ;;  %p1334_p12 = scmp.lt.s32.totalorder %s1332_s23, %s1325_s19 }
  0x26   : > { %p1329_p10 = pneg %p1328_p8  ;;  %p1335_p13 = por %p1334_p12, %p1333_p3 }
  0x28   : > { %p1336_p0 = pnand %p1335_p13, %p1329_p10 }
  0x2a   : > { %1339 = shalt.err (!%p1336_p0)
}
  0x2b   : > { %s1487_s25 = smov 3328   ;;  %s1488_s26 = smov 1664  }
  0x2c   : > { %s1489_s27 = smov 104   ;;  %s1611_s30 = sadd.s32 4294967295, %s1484_s17  }
  0x2d   : > { %1240 = dma.hbm_to_vmem [thread:$0]  (!%p1576_p7), %s1574_s28, 6656, %s1580_s4, %s1582_s5, %s1487_s25, %s1488_s26, %s1489_s27  }
  0x2e   : > { %s1126_s6 = sadd.s32 4294967294, %s1484_s17   ;;  %p75_p3 = scmp.ne.s32.totalorder %s1468_s13, %s1464_s12 }
  0x2f   : > { %p1873_p11 = scmp.eq.s32.totalorder %s1611_s30, 0  ;;  %p129_p2 = scmp.eq.s32.totalorder %s1611_s30, 1 }
  0x30   : > { %p135_p4 = scmp.eq.s32.totalorder %s1126_s6, 1  ;;  %p1127_p6 = scmp.ge.s32.totalorder %s1484_s17, 1 }
  0x31   : > { %p1620_p5 = por %p1873_p11, %p75_p3  ;;  %p1628_p8 = por %p129_p2, %p69_p1 }
  0x32   : > { %p1632_p10 = por %p135_p4, %p75_p3  ;;  %p142_p12 = scmp.lt.s32.totalorder %s1484_s17, 3 }
  0x33   : > { %s1884_s7 = scalar_select %p1620_p5, 1, 0 }
  0x34   : > { %s1885_s28 = scalar_select %p1628_p8, 1, 0 }
  0x35   : > { %s1886_s4 = scalar_select %p1632_p10, 1, 0 }
  0x36   : > { %p1637_p13 = pnand %p1127_p6, %p142_p12  ;;  %s1490_s9 = smov [#allocation3]  }
  0x37   : > { %s154_s10 = sshll.u32 %s1490_s9, 4  ;;  %s1219_s11 = smul.u32 13, %s170_s22  ;;  %s1641_s10 = int_to_ptr.vmem [resolvable:$true] %s154_s10 }
  0x38   : > { %s1887_s8 = scalar_select %p1637_p13, 1, 0 }
  0x39   : > { %p1233_p0 = pneg %p1637_p13  ;;  %s1146_s19 = smul.u32 208, %s1480_s16 }
  0x3a   : > { %s194_s26 = scalar_lea.vmem [#allocation8], %s1219_s11  ;;  %s1340_s22 = scalar_lea.hbm %s1868_s0, 256 }
  0x3b   : > { %p1650_p1 = pnand %p1233_p0, %p1873_p11  ;;  %s1657_s25 = scalar_lea.hbm %s1870_s2, %s1146_s19 }
  0x3c   : > { %s203_s27 = sshll.u32 %s194_s26, 4  ;;  %p1341_p3 = scmp.ne.s32.totalorder %s1868_s0, %s1340_s22  ;;  %s1659_s27 = int_to_ptr.vmem [resolvable:$true] %s203_s27 }
  0x3d   : > { %p1342_p2 = pneg %p1650_p1  ;;  %p1347_p12 = scmp.lt.u32.totalorder %s1340_s22, %s1868_s0 }
  0x3f   : > { %p1343_p4 = pnand %p1342_p2, %p1341_p3 }
  0x41   : > { %p1344_p6 = pneg %p1343_p4 }
  0x43   : > { %p1349_p0 = pnand %p1347_p12, %p1344_p6 }
  0x45   : > { %1352 = shalt.err (!%p1349_p0)
}
  0x46   : > { %s1353_s11 = scalar_lea.vmem %s1641_s10, 256  ;;  %p1361_p8 = scmp.lt.s32.totalorder %s1641_s10, %s1641_s10 }
  0x47   : > { %p1354_p11 = scmp.ne.s32.totalorder %s1641_s10, %s1353_s11  ;;  %p1362_p5 = scmp.lt.s32.totalorder %s1353_s11, %s1353_s11 }
  0x49   : > { %p1356_p9 = pnand %p1354_p11, %p1342_p2  ;;  %p1363_p13 = por %p1362_p5, %p1361_p8 }
  0x4b   : > { %p1357_p10 = pneg %p1356_p9 }
  0x4d   : > { %p1364_p7 = pnand %p1363_p13, %p1357_p10 }
  0x4f   : > { %1367 = shalt.err (!%p1364_p7)
}
  0x50   : > { %s1491_s1 = smov 128   ;;  %s1492_s18 = smov 8  }
  0x51   : > { %1236 = dma.hbm_to_vmem [thread:$0]  (!%p1650_p1), %s1868_s0, 256, %s1641_s10, [#allocation4], %s1491_s1, %s1491_s1, %s1492_s18  }
  0x52   : > { %s1368_s6 = scalar_lea.hbm %s1657_s25, 208  ;;  %p1889_p11 = scmp.ne.s32.totalorder %s1883_s29, 0 }
  0x53   : > { %p1369_p9 = scmp.ne.s32.totalorder %s1657_s25, %s1368_s6  ;;  %s1373_s21 = scalar_lea.hbm %s1870_s2, 416 }
  0x54   : > { %p1890_p5 = pneg %p1889_p11  ;;  %p1374_p10 = scmp.lt.u32.totalorder %s1657_s25, %s1870_s2 }
  0x55   : > { %p1375_p13 = scmp.lt.u32.totalorder %s1373_s21, %s1368_s6  ;;  %p1377_p2 = scmp.lt.u32.totalorder %s1368_s6, %s1657_s25 }
  0x56   : > { %p1371_p8 = pnand %p1369_p9, %p1890_p5 }
  0x57   : > { %p1376_p3 = por %p1375_p13, %p1374_p10 }
  0x58   : > { %p1372_p7 = pneg %p1371_p8 }
  0x59   : > { %p1378_p4 = por %p1377_p2, %p1376_p3 }
  0x5b   : > { %p1379_p6 = pnand %p1378_p4, %p1372_p7 }
  0x5d   : > { %1382 = shalt.err (!%p1379_p6)
}
  0x5e   : > { %s1383_s10 = scalar_lea.vmem %s1659_s27, 208  ;;  %p1891_p12 = pmov %p1890_p5 }
  0x5f   : > { %p1384_p1 = scmp.ne.s32.totalorder %s1659_s27, %s1383_s10  ;;  %s1493_s20 = smov [#allocation8]  }
  0x60   : > { %s1388_s1 = sshll.u32 %s1493_s20, 4  ;;  %s1389_s1 = int_to_ptr.vmem [resolvable:$false] %s1388_s1 }
  0x61   : > { %p1386_p0 = pnand %p1384_p1, %p1891_p12  ;;  %s1390_s18 = scalar_lea.vmem %s1389_s1, 416 }
  0x62   : > { %p1391_p5 = scmp.lt.s32.totalorder %s1659_s27, %s1389_s1  ;;  %p1392_p8 = scmp.lt.s32.totalorder %s1390_s18, %s1383_s10 }
  0x63   : > { %p1387_p9 = pneg %p1386_p0 }
  0x64   : > { %p1393_p10 = por %p1392_p8, %p1391_p5 }
  0x66   : > { %p1394_p13 = pnand %p1393_p10, %p1387_p9 }
  0x68   : > { %1397 = shalt.err (!%p1394_p13)
}
  0x69   : > { %1243 = dma.hbm_to_vmem [thread:$0]  (!%p1889_p11), %s1657_s25, 208, %s1659_s27, %s1582_s5  }
  0x6a   : > { %p1892_p7 = scmp.ne.s32.totalorder %s1887_s8, 0 }
  0x6b   : > { %p1893_p3 = scmp.eq.s32.totalorder (!%p1892_p7), %s1611_s30, 0 }
  0x6c   : > { %212 = sbr.rel (%p1892_p7) target bundleno = 405 (0x195), region = 32 }
  0x73   : > { %1451 = dma.done.wait (%p1893_p3), [#allocation4], 256   ;;  %p1894_p2 = pmov %p1893_p3 }
  0x74   : > { %s218_s19 = sand.u32 1, %s1611_s30   ;;  %s1714_s26 = sand.u32 1, %s1468_s13  }
  0x75   : > { %1453 = vsyncadd (%p1894_p2), [#allocation4], 4294967040  ;;  %s1220_s29 = smul.u32 416, %s1714_s26  ;;  %s219_s6 = scalar_lea.sflag [#allocation7], %s218_s19 }
  0x76   : > { %p1895_p11 = scmp.ne.s32.totalorder %s1884_s7, 0 }
  0x77   : > { %s1717_s9 = scalar_lea.vmem [#allocation6], %s1220_s29 }
  0x78   : > { %1455 = dma.done.wait (%p1895_p11), %s219_s6, 6864  }
  0x79   : > { %1457 = vsyncadd (%p1895_p11), %s219_s6, 4294960432  ;;  %v1494_v0 = vmov 0.0   ;;  %v297_v1 = vld [vmem:[%s1717_s9 + $0x8] sm:$0xff]  ;;  %v310_v2 = vld [vmem:[%s1717_s9 + $0x70] sm:$0xff]  ;;  %vm271_vm0 = vcmask 261120   ;;  %vm290_vm1 = vcmask 1041409  }
  0x7a   : > { %485 = vmatprep.mubr.f32.mxu0 %v1494_v0  ;;  %556 = vmatprep.mubr.f32.mxu1 %v1494_v0  ;;  %v299_v3 = vld [vmem:[%s1717_s9 + $0x18] sm:$0xff]  ;;  %v1164_v4 = vpack.c.bf16 %v310_v2, %v297_v1  ;;  %v312_v5 = vld [vmem:[%s1717_s9 + $0x80] sm:$0xff]  ;;  %v309_v7 = vld [vmem:[%s1717_s9 + $0x68] sm:$0xff]  ;;  %vm293_vm2 = vcmask 254976   ;;  %vm1496_vm3 = vmmov 0   ;;  %s1221_s5 = smul.u32 13, %s1714_s26 }
  0x7b   : > { %v296_v6 = vld [vmem:[%s1717_s9] sm:$0xff]  ;;  %v1172_v8 = vpack.c.bf16 %v312_v5, %v299_v3  ;;  %v298_v10 = vld [vmem:[%s1717_s9 + $0x10] sm:$0xff]  ;;  %v311_v11 = vld [vmem:[%s1717_s9 + $0x78] sm:$0xff]  ;;  %s1222_s7 = smul.u32 26, %s1714_s26  ;;  %p1896_p6 = scmp.ne.s32.totalorder %s1885_s28, 0 }
  0x7c   : > { %v1166_v9 = vpack.c.bf16 %v309_v7, %v296_v6  ;;  %v323_v12 = vld [vmem:[%s1717_s9 + $0xd8] sm:$0xff]  ;;  %1165 = vmatprep.subr.bf16.mxu0 %v1164_v4  ;;  %v1174_v13 = vpack.c.bf16 %v311_v11, %v298_v10  ;;  %v336_v14 = vld [vmem:[%s1717_s9 + $0x140] sm:$0xff]  ;;  %v325_v15 = vld [vmem:[%s1717_s9 + $0xe8] sm:$0xff]  ;;  %s1796_s30 = scalar_lea.vmem [#allocation8], %s1221_s5  ;;  %s1147_s25 = smul.u32 416, %s1476_s15 }
  0x7d   : > { %v338_v16 = vld [vmem:[%s1717_s9 + $0x150] sm:$0xff]  ;;  %1173 = vmatprep.subr.bf16.mxu1 %v1172_v8  ;;  %v1168_v17 = vpack.c.bf16 %v336_v14, %v323_v12  ;;  %v335_v20 = vld [vmem:[%s1717_s9 + $0x138] sm:$0xff]  ;;  %v324_v21 = vld [vmem:[%s1717_s9 + $0xe0] sm:$0xff]  ;;  %s1807_s8 = scalar_lea.vmem [#allocation9], %s1222_s7  ;;  %s997_s15 = scalar_lea.sflag [#allocation5], %s1714_s26 }
  0x7e   : > { %1167 = vmatpush1.bf16.msra.mxu0 %v1166_v9  ;;  %v1176_v18 = vpack.c.bf16 %v338_v16, %v325_v15  ;;  %v322_v19 = vld [vmem:[%s1717_s9 + $0xd0] sm:$0xff]  ;;  %1175 = vmatpush1.bf16.msra.mxu1 %v1174_v13  ;;  %v337_v23 = vld [vmem:[%s1717_s9 + $0x148] sm:$0xff]  ;;  %v303_v28 = vld [vmem:[%s1717_s9 + $0x38] sm:$0xff]  ;;  %s1012_s27 = sshll.u32 %s1807_s8, 4  ;;  %s1817_s23 = scalar_lea.hbm %s1871_s3, %s1147_s25  ;;  %s1819_s27 = int_to_ptr.vmem [resolvable:$true] %s1012_s27 }
  0x7f   : > { %v1170_v22 = vpack.c.bf16 %v335_v20, %v322_v19  ;;  %v301_v24 = vld [vmem:[%s1717_s9 + $0x28] sm:$0xff]  ;;  %v314_v25 = vld [vmem:[%s1717_s9 + $0x90] sm:$0xff]  ;;  %1169 = vmatprep.subr.bf16.mxu0 %v1168_v17  ;;  %v1178_v26 = vpack.c.bf16 %v337_v23, %v324_v21  ;;  %v316_v29 = vld [vmem:[%s1717_s9 + $0xa0] sm:$0xff]  ;;  %s1398_s11 = scalar_lea.vmem %s1819_s27, 416  ;;  %s1498_s10 = smov [#allocation9]  }
  0x80   : > { %1177 = vmatprep.subr.bf16.mxu1 %v1176_v18  ;;  %v1180_v27 = vpack.c.bf16 %v314_v25, %v301_v24  ;;  %v269_v30 = vld [vmem:[#allocation3] sm:$0xff]  ;;  %v1188_v31 = vpack.c.bf16 %v316_v29, %v303_v28  ;;  %v270_v32 = vld [vmem:[#allocation3 + $0x8] sm:$0xff]  ;;  %v300_v50 = vld [vmem:[%s1717_s9 + $0x20] sm:$0xff]  ;;  %p1399_p4 = scmp.ne.s32.totalorder %s1819_s27, %s1398_s11  ;;  %s1402_s20 = sshll.u32 %s1498_s10, 4  ;;  %s1403_s20 = int_to_ptr.vmem [resolvable:$false] %s1402_s20 }
  0x81   : > { %v272_v33 = vsel %vm271_vm0, %v269_v30, 0.0  ;;  %v279_v35 = vsel %vm271_vm0, %v270_v32, 0.0  ;;  %v313_v51 = vld [vmem:[%s1717_s9 + $0x88] sm:$0xff]  ;;  %v302_v52 = vld [vmem:[%s1717_s9 + $0x30] sm:$0xff]  ;;  %v315_v53 = vld [vmem:[%s1717_s9 + $0x98] sm:$0xff]  ;;  %s1404_s1 = scalar_lea.vmem %s1403_s20, 832  ;;  %p1405_p0 = scmp.lt.s32.totalorder %s1819_s27, %s1403_s20 }
  0x82   : > { %1171 = vmatpush1.bf16.msra.mxu0 %v1170_v22  ;;  %v273_v34 = vrot.slane %v272_v33, 4  ;;  %1179 = vmatpush1.bf16.msra.mxu1 %v1178_v26  ;;  %v280_v36 = vrot.slane %v279_v35, 4  ;;  %v327_v54 = vld [vmem:[%s1717_s9 + $0xf8] sm:$0xff]  ;;  %v340_v55 = vld [vmem:[%s1717_s9 + $0x160] sm:$0xff]  ;;  %v329_v56 = vld [vmem:[%s1717_s9 + $0x108] sm:$0xff]  ;;  %v1182_v58 = vpack.c.bf16 %v313_v51, %v300_v50  ;;  %v1190_v59 = vpack.c.bf16 %v315_v53, %v302_v52  ;;  %p1400_p1 = pnand %p1399_p4, %p1896_p6  ;;  %p1406_p9 = scmp.lt.s32.totalorder %s1404_s1, %s1398_s11 }
  0x83   : > { %1181 = vmatprep.subr.bf16.mxu0 %v1180_v27  ;;  %1189 = vmatprep.subr.bf16.mxu1 %v1188_v31  ;;  %v342_v57 = vld [vmem:[%s1717_s9 + $0x170] sm:$0xff]  ;;  %v339_v61 = vld [vmem:[%s1717_s9 + $0x158] sm:$0xff]  ;;  %v328_v62 = vld [vmem:[%s1717_s9 + $0x100] sm:$0xff]  ;;  %v1184_v63 = vpack.c.bf16 %v340_v55, %v327_v54 }
  0x84   : > { %v274_v37 = vadd.f32 %v273_v34, %v272_v33  ;;  %v281_v38 = vadd.f32 %v280_v36, %v279_v35  ;;  %v326_v60 = vld [vmem:[%s1717_s9 + $0xf0] sm:$0xff]  ;;  %v1192_v1 = vpack.c.bf16 %v342_v57, %v329_v56  ;;  %v341_v2 = vld [vmem:[%s1717_s9 + $0x168] sm:$0xff]  ;;  %v307_v6 = vld [vmem:[%s1717_s9 + $0x58] sm:$0xff]  ;;  %v1495_v33 = vmov 0.0|0.0   ;;  %p1401_p12 = pneg %p1400_p1  ;;  %p1407_p5 = por %p1406_p9, %p1405_p0 }
  0x85   : > { %v305_v3 = vld [vmem:[%s1717_s9 + $0x48] sm:$0xff]  ;;  %v318_v4 = vld [vmem:[%s1717_s9 + $0xb0] sm:$0xff]  ;;  %v320_v7 = vld [vmem:[%s1717_s9 + $0xc0] sm:$0xff]  ;;  %v1186_v8 = vpack.c.bf16 %v339_v61, %v326_v60  ;;  %v1194_v9 = vpack.c.bf16 %v341_v2, %v328_v62 }
  0x86   : > { %v275_v39 = vrot.slane %v274_v37, 2  ;;  %v282_v40 = vrot.slane %v281_v38, 2  ;;  %v304_v10 = vld [vmem:[%s1717_s9 + $0x40] sm:$0xff]  ;;  %v317_v11 = vld [vmem:[%s1717_s9 + $0xa8] sm:$0xff]  ;;  %v1196_v12 = vpack.c.bf16 %v318_v4, %v305_v3  ;;  %v1204_v13 = vpack.c.bf16 %v320_v7, %v307_v6  ;;  %v306_v14 = vld [vmem:[%s1717_s9 + $0x50] sm:$0xff]  ;;  %p1408_p8 = pnand %p1407_p5, %p1401_p12 }
  0x87   : > { %v319_v15 = vld [vmem:[%s1717_s9 + $0xb8] sm:$0xff]  ;;  %v344_v17 = vld [vmem:[%s1717_s9 + $0x180] sm:$0xff]  ;;  %v333_v18 = vld [vmem:[%s1717_s9 + $0x128] sm:$0xff]  ;;  %v1198_v20 = vpack.c.bf16 %v317_v11, %v304_v10 }
  0x88   : > { %v276_v41 = vadd.f32 %v275_v39, %v274_v37  ;;  %v283_v42 = vadd.f32 %v282_v40, %v281_v38  ;;  %v331_v16 = vld [vmem:[%s1717_s9 + $0x118] sm:$0xff]  ;;  %v346_v19 = vld [vmem:[%s1717_s9 + $0x190] sm:$0xff]  ;;  %v1206_v21 = vpack.c.bf16 %v319_v15, %v306_v14  ;;  %v332_v26 = vld [vmem:[%s1717_s9 + $0x120] sm:$0xff]  ;;  %v352_v37 = vlaneseq }
  0x89   : > { %v330_v22 = vld [vmem:[%s1717_s9 + $0x110] sm:$0xff]  ;;  %v1200_v23 = vpack.c.bf16 %v344_v17, %v331_v16  ;;  %v1208_v24 = vpack.c.bf16 %v346_v19, %v333_v18  ;;  %v343_v25 = vld [vmem:[%s1717_s9 + $0x178] sm:$0xff]  ;;  %v345_v27 = vld [vmem:[%s1717_s9 + $0x188] sm:$0xff]  ;;  %v1497_v39 = vmov 1983009808  }
  0x8a   : > { %v277_v43 = vrot.slane %v276_v41, 1  ;;  %v284_v44 = vrot.slane %v283_v42, 1  ;;  %v1202_v28 = vpack.c.bf16 %v343_v25, %v330_v22  ;;  %v1210_v29 = vpack.c.bf16 %v345_v27, %v332_v26  ;;  %v308_v30 = vld [vmem:[%s1717_s9 + $0x60] sm:$0xff]  ;;  %v321_v31 = vld [vmem:[%s1717_s9 + $0xc8] sm:$0xff]  ;;  %v334_v34 = vld [vmem:[%s1717_s9 + $0x130] sm:$0xff] }
  0x8b   : > { %v1213_v32 = vpack.c.bf16 %v321_v31, %v308_v30  ;;  %v347_v35 = vld [vmem:[%s1717_s9 + $0x198] sm:$0xff]  ;;  %v1792_v38 = vshrl.u32 %v352_v37, 7  ;;  %v933_v40 = vunpack.c.l.s4 %v1497_v39 }
  0x8c   : > { %v278_v45 = vadd.f32 %v277_v43, %v276_v41  ;;  %v285_v46 = vadd.f32 %v284_v44, %v283_v42  ;;  %v1216_v36 = vpack.c.bf16 %v347_v35, %v334_v34  ;;  %v348_v43 = vld [vmem:[%s1796_s30] sm:$0xff]  ;;  %v349_v17 = vld [vmem:[%s1796_s30 + $0x8] sm:$0x1f] }
  0x8d   : > { %v354_v41 = vsub.s32 0, %v1792_v38  ;;  %v362_v42 = vsub.s32 2, %v1792_v38  ;;  %v366_v44 = vsub.s32 3, %v1792_v38  ;;  %v370_v57 = vsub.s32 4, %v1792_v38 }
  0x8e   : > { %v286_v47 = vmul.f32 0.125, %v278_v45  ;;  %v287_v48 = vmul.f32 0.125, %v285_v46  ;;  %v934_v45 = vunpack.c.0.s8 %v933_v40  ;;  %v374_v61 = vsub.s32 5, %v1792_v38 }
  0x8f   : > { %v355_v46 = vrot.slane %v348_v43, %v354_v41  ;;  %v382_v62 = vsub.s32 7, %v1792_v38  ;;  %v371_v2 = vrot.slane %v348_v43, %v370_v57  ;;  %v399_v25 = vrot.slane %v349_v17, %v366_v44 }
  0x90   : > { %v291_v49 = vsel %vm290_vm1, %v287_v48, %v286_v47  ;;  %v363_v47 = vrot.slane %v348_v43, %v362_v42  ;;  %v937_v52 = vsub.s32 %v934_v45, %v1792_v38  ;;  %v375_v6 = vrot.slane %v348_v43, %v374_v61 }
  0x91   : > { %294 = vst.msk [vmem:[#allocation2] sm:$0x3] %vm293_vm2, %v291_v49  ;;  %v367_v49 = vrot.slane %v348_v43, %v366_v44  ;;  %v383_v7 = vrot.slane %v348_v43, %v382_v62  ;;  %v403_v37 = vrot.slane %v349_v17, %v370_v57 }
  0x98   : > { %v295_v5 = vld [vmem:[#allocation2] sm:$0x3] }
  0x99   : > { %1134 = vmatmul.mubr.msk.f32.vlgmr.msra.gmra.mrb[0].mxu0 %vm271_vm0, %v295_v5  ;;  %1135 = vmatmul.mubr.msk.f32.vlgmr.msra.gmra.mrb[0].mxu1 %vm271_vm0, %v295_v5 }
  0x9a   : > { %1183 = vmatpush1.bf16.msra.mxu0 %v1182_v58  ;;  %1191 = vmatpush1.bf16.msra.mxu1 %v1190_v59  ;;  %v378_v58 = vsub.s32 6, %v1792_v38 }
  0x9b   : > { %1185 = vmatprep.subr.bf16.mxu0 %v1184_v63  ;;  %1193 = vmatprep.subr.bf16.mxu1 %v1192_v1 }
  0x9c   : > { %627 = vmatprep.mubr.f32.mxu0 %v1494_v0  ;;  %698 = vmatprep.mubr.f32.mxu1 %v1494_v0  ;;  %v379_v3 = vrot.slane %v348_v43, %v378_v58 }
  0x9e   : > { %1187 = vmatpush1.bf16.msra.mxu0 %v1186_v8  ;;  %1195 = vmatpush1.bf16.msra.mxu1 %v1194_v9 }
  0x9f   : > { %1197 = vmatprep.subr.bf16.mxu0 %v1196_v12  ;;  %1205 = vmatprep.subr.bf16.mxu1 %v1204_v13 }
  0xa1   : > { %1136 = vmatmul.mubr.msk.f32.vlgmr.msra.gmra.mrb[2].mxu0 %vm271_vm0, %v295_v5  ;;  %1137 = vmatmul.mubr.msk.f32.vlgmr.msra.gmra.mrb[2].mxu1 %vm271_vm0, %v295_v5 }
  0xa2   : > { %1199 = vmatpush1.bf16.msra.mxu0 %v1198_v20  ;;  %1207 = vmatpush1.bf16.msra.mxu1 %v1206_v21  ;;  %v387_v20 = vrot.slane %v349_v17, %v354_v41  ;;  %v395_v21 = vrot.slane %v349_v17, %v362_v42 }
  0xa3   : > { %1201 = vmatprep.subr.bf16.mxu0 %v1200_v23  ;;  %1209 = vmatprep.subr.bf16.mxu1 %v1208_v24 }
  0xa4   : > { %769 = vmatprep.mubr.f32.mxu0 %v1494_v0  ;;  %840 = vmatprep.mubr.f32.mxu1 %v1494_v0 }
  0xa6   : > { %1203 = vmatpush1.bf16.msra.mxu0 %v1202_v28  ;;  %1211 = vmatpush1.bf16.msra.mxu1 %v1210_v29 }
  0xa7   : > { %1212 = vmatprep.subr.bf16.mxu0 %v1495_v33 }
  0xa9   : > { %1138 = vmatmul.mubr.msk.f32.vlgmr.msra.gmra.mrb[4].mxu0 %vm271_vm0, %v295_v5  ;;  %1139 = vmatmul.mubr.msk.f32.vlgmr.msra.gmra.mrb[4].mxu1 %vm271_vm0, %v295_v5 }
  0xaa   : > { %1214 = vmatpush3.bf16.msra.mxu0 %v1213_v32  ;;  %1161 = vmatprep.mubr.msk.f32.mxu0 %vm1496_vm3, %v1494_v0  ;;  %v358_v0 = vsub.s32 1, %v1792_v38 }
  0xab   : > { %1215 = vmatprep.subr.bf16.mxu0 %v1495_v33 }
  0xac   : > { %v359_v48 = vrot.slane %v348_v43, %v358_v0  ;;  %v391_v24 = vrot.slane %v349_v17, %v358_v0 }
  0xae   : > { %1217 = vmatpush3.bf16.msra.mxu0 %v1216_v36 }
  0xb1   : > { %1162 = vmatmul.mubr.msk.f32.vlgmr.msra.gmra.mrb[6].mxu0 %vm271_vm0, %v295_v5 }
 0x16c   : > { %v487_v50 = vpop.f32.mrb[0].mxu0  ;;  %v558_v51 = vpop.f32.mrb[0].mxu1 }
 0x16d   : > { %v488_v53 = vadd.f32 %v487_v50, %v355_v46  ;;  %v559_v54 = vadd.f32 %v558_v51, %v363_v47  ;;  %v489_v55 = vpop.f32.mrb[1].mxu0  ;;  %v560_v56 = vpop.f32.mrb[1].mxu1 }
 0x16e   : > { %v490_v59 = vadd.f32 %v489_v55, %v359_v48  ;;  %v561_v60 = vadd.f32 %v560_v56, %v367_v49 }
 0x170   : > { %v930_v63 = vcombine.low %v488_v53, %v490_v59  ;;  %v931_v1 = vcombine.low %v559_v54, %v561_v60 }
 0x172   : > { %v938_v4 = vrot.slane %v930_v63, %v937_v52  ;;  %v945_v5 = vrot.slane %v931_v1, %v937_v52 }
 0x174   : > { %v946_v8 = vcombine.low %v938_v4, %v945_v5  ;;  %v629_v9 = vpop.f32.mrb[2].mxu0  ;;  %v700_v10 = vpop.f32.mrb[2].mxu1 }
 0x175   : > { %v630_v11 = vadd.f32 %v629_v9, %v371_v2  ;;  %v701_v12 = vadd.f32 %v700_v10, %v379_v3  ;;  %v631_v13 = vpop.f32.mrb[3].mxu0  ;;  %v702_v14 = vpop.f32.mrb[3].mxu1 }
 0x176   : > { %992 = vst [vmem:[%s1807_s8] sm:$0xff] %v946_v8  ;;  %v632_v15 = vadd.f32 %v631_v13, %v375_v6  ;;  %v703_v16 = vadd.f32 %v702_v14, %v383_v7 }
 0x178   : > { %v947_v18 = vcombine.low %v630_v11, %v632_v15  ;;  %v948_v19 = vcombine.low %v701_v12, %v703_v16 }
 0x17a   : > { %v955_v22 = vrot.slane %v947_v18, %v937_v52  ;;  %v962_v23 = vrot.slane %v948_v19, %v937_v52 }
 0x17c   : > { %v963_v26 = vcombine.low %v955_v22, %v962_v23  ;;  %v771_v27 = vpop.f32.mrb[4].mxu0  ;;  %v842_v28 = vpop.f32.mrb[4].mxu1 }
 0x17d   : > { %v772_v29 = vadd.f32 %v771_v27, %v387_v20  ;;  %v843_v30 = vadd.f32 %v842_v28, %v395_v21  ;;  %v773_v31 = vpop.f32.mrb[5].mxu0  ;;  %v844_v32 = vpop.f32.mrb[5].mxu1 }
 0x17e   : > { %993 = vst [vmem:[%s1807_s8 + $0x8] sm:$0xff] %v963_v26  ;;  %v774_v33 = vadd.f32 %v773_v31, %v391_v24  ;;  %v845_v34 = vadd.f32 %v844_v32, %v399_v25 }
 0x180   : > { %v964_v35 = vcombine.low %v772_v29, %v774_v33  ;;  %v965_v36 = vcombine.low %v843_v30, %v845_v34 }
 0x182   : > { %v972_v38 = vrot.slane %v964_v35, %v937_v52  ;;  %v979_v39 = vrot.slane %v965_v36, %v937_v52 }
 0x184   : > { %v980_v40 = vcombine.low %v972_v38, %v979_v39  ;;  %v913_v41 = vpop.f32.mrb[6].mxu0 }
 0x185   : > { %v914_v42 = vadd.f32 %v913_v41, %v403_v37  ;;  %v1163_v43 = vpop.f32.mrb[7].mxu0 }
 0x186   : > { %994 = vst [vmem:[%s1807_s8 + $0x10] sm:$0xff] %v980_v40 }
 0x187   : > { %1141 = vst.sshfl [vmem:[%s1807_s8 + $0x18] sm:$0x3 pattern:$0x76325410] %v914_v42 }
 0x188   : > { %1411 = shalt.err (!%p1408_p8)
}
 0x189   : > { %s1412_s18 = scalar_lea.hbm %s1817_s23, 416  ;;  %s1416_s29 = scalar_lea.hbm %s1871_s3, 832 }
 0x18a   : > { %p1413_p10 = scmp.ne.s32.totalorder %s1817_s23, %s1412_s18  ;;  %p1417_p3 = scmp.lt.u32.totalorder %s1817_s23, %s1871_s3 }
 0x18b   : > { %p1418_p2 = scmp.lt.u32.totalorder %s1416_s29, %s1412_s18  ;;  %p1420_p4 = scmp.lt.u32.totalorder %s1412_s18, %s1817_s23 }
 0x18c   : > { %p1414_p13 = pnand %p1413_p10, %p1896_p6 }
 0x18d   : > { %p1419_p11 = por %p1418_p2, %p1417_p3 }
 0x18e   : > { %p1415_p7 = pneg %p1414_p13 }
 0x18f   : > { %p1421_p1 = por %p1420_p4, %p1419_p11 }
 0x191   : > { %p1422_p12 = pnand %p1421_p1, %p1415_p7 }
 0x193   : > { %1425 = shalt.err (!%p1422_p12)
}
 0x194   : > { %1231 = dma.vmem_to_hbm [thread:$0]  (%p1896_p6), %s1819_s27, 416, %s1817_s23, %s997_s15  }
 0x195 PF: > { %s1024_s5 = sand.u32 1, %s1464_s12   ;;  %p1897_p0 = scmp.ne.s32.totalorder %s1886_s4, 0 }
 0x196   : > { %p1898_p9 = scmp.ge.s32.totalorder %s1484_s17, 2  ;;  %s1025_s30 = scalar_lea.sflag [#allocation5], %s1024_s5 }
 0x198   : > { %p1245_p5 = pnand %p1898_p9, %p1897_p0 }
 0x19a   : > { %1459 = dma.done.wait (!%p1245_p5), %s1025_s30, 416  }
 0x19b   : > { %1461 = vsyncadd (!%p1245_p5), %s1025_s30, 4294966880  ;;  %s20_s17 = sadd.s32 1, %s1484_s17   ;;  %s1899_s28 = sld [smem:[#allocation13_spill]] }
 0x19c   : > { %p17_p8 = scmp.ge.s32.totalorder %s20_s17, 4   ;;  %s1900_s12 = smov %s1468_s13 }
 0x19d   : > { %s1901_s13 = smov %s1472_s14  ;;  %s1902_s14 = smov %s1567_s24 }
 0x19e   : > { %s1903_s15 = smov %s1480_s16  ;;  %19 = sbr.rel (!%p17_p8) target bundleno = 9 (0x9), region = 97 }
 0x1a1   : > { %s1904_s16 = smov %s1899_s28 }
 0x1a5   :  { %1030 = vsyncpa [#allocation4], 1 }
 0x1a6   :  { %1032 = vsyncpa [#allocation4 + $0x1], 1 }
 0x1a7   :  { %1033 = vsyncpa [#allocation7], 1 }
 0x1a8   :  { %1035 = vsyncpa [#allocation7 + $0x1], 1 }
 0x1a9   :  { %1036 = vsyncpa [#allocation5], 1 }
 0x1aa   :  { %1038 = vsyncpa [#allocation5 + $0x1], 1 }

</bundles_post_ra>
